<compile_context>
chip_gen: v5e
topology: v5e:2x2
jax: 0.10.0
libtpu: 0.0.40
codegen_flags: <defaults>
</compile_context>

<pallas_src>
import jax
import jax.numpy as jnp
from jax.experimental import pallas as pl
from jax.experimental.pallas import tpu as pltpu

LANE = 128


def _round_up(n, m=LANE):
    return ((n + m - 1) // m) * m


def _pad2d(x, rows, cols):
    return jnp.pad(x, ((0, rows - x.shape[0]), (0, cols - x.shape[1])))


# ----------------------------------------------------------------------------
# Single fused kernel: GC1+ReLU, GC2+ReLU (both branches via block-diag adj),
# mean_nodes via pooling matmuls, branch product, and the MLP head.
# Everything lives in VMEM; only l1 / l3 are written back.
# ----------------------------------------------------------------------------
def mygcn_fused_kernel(adj_ref, x_ref,
                       gc1w_ref, gc1b_ref, gc2w_ref, gc2b_ref,
                       pool1_ref, pool2_ref,
                       l1w_ref, l1b_ref, l2w_ref, l2b_ref, l3w_ref, l3b_ref,
                       out_l1_ref, out_l3_ref):
    a = adj_ref[...]                      # (BN, BN) block-diag normalized adj
    h = x_ref[...]                        # (BN, Fp) zero-padded node features

    # GraphConv 1 (+ReLU): shared weights, both branches batched block-diag.
    h = jnp.dot(h, gc1w_ref[...], preferred_element_type=jnp.float32)
    h = jnp.dot(a, h, preferred_element_type=jnp.float32) + gc1b_ref[...]
    h = jnp.maximum(h, 0.0)

    # GraphConv 2 (+ReLU).
    h = jnp.dot(h, gc2w_ref[...], preferred_element_type=jnp.float32)
    h = jnp.dot(a, h, preferred_element_type=jnp.float32) + gc2b_ref[...]
    h = jnp.maximum(h, 0.0)

    # dgl.mean_nodes per branch as pooling matmuls, then elementwise product.
    hg1 = jnp.dot(pool1_ref[...], h, preferred_element_type=jnp.float32)   # (G, Hp)
    hg2 = jnp.dot(pool2_ref[...], h, preferred_element_type=jnp.float32)   # (G, Hp)
    hg = hg1 * hg2

    # MLP head (no activations, matching the PyTorch module).
    l1 = jnp.dot(hg, l1w_ref[...], preferred_element_type=jnp.float32) + l1b_ref[...]
    l2 = jnp.dot(l1, l2w_ref[...], preferred_element_type=jnp.float32) + l2b_ref[...]
    l3 = jnp.dot(l2, l3w_ref[...], preferred_element_type=jnp.float32) + l3b_ref[...]

    out_l1_ref[...] = l1
    out_l3_ref[...] = l3


# ----------------------------------------------------------------------------
# Forward wrapper: builds the block-diagonal adjacency, flattened lane-dense
# feature slab and pooling matrices (cheap glue), then ONE pallas_call.
# ----------------------------------------------------------------------------
@jax.jit
def mygcn_forward(padded_params, adj1, adj2, fea1, fea2):
    G, N, nfeat = fea1.shape
    B = 2 * G                       # graphs across both branches
    BN = B * N                      # total nodes across both branches
    Fp = padded_params["gc1_w"].shape[0]

    # DGL-style batching: block-diagonal normalized adjacency over all graphs
    # of both branches -> each GraphConv is a single dense matmul.
    adjs = jnp.concatenate([adj1, adj2], axis=0)                   # (B, N, N)
    eye = jnp.eye(B, dtype=adjs.dtype)
    adj_bd = (eye[:, None, :, None] * adjs[:, :, None, :]).reshape(BN, BN)

    # Node features of both branches flattened to one lane-dense (BN, Fp) slab.
    x = jnp.concatenate([fea1, fea2], axis=0).reshape(BN, nfeat)
    x = jnp.pad(x, ((0, 0), (0, Fp - nfeat)))

    # mean_nodes pooling matrices (1/N over each graph's nodes).
    seg = jnp.arange(BN, dtype=jnp.int32) // N                     # graph id per node
    pool = (seg[None, :] == jnp.arange(B, dtype=jnp.int32)[:, None])
    pool = pool.astype(jnp.float32) / N                            # (B, BN)
    pool1, pool2 = pool[:G], pool[G:]                              # branch 1 / branch 2

    vmem = pl.BlockSpec(memory_space=pltpu.MemorySpace.VMEM)
    out_l1, out_l3 = pl.pallas_call(
        mygcn_fused_kernel,
        out_shape=(
            jax.ShapeDtypeStruct((G, padded_params["l1_w"].shape[-1]), jnp.float32),
            jax.ShapeDtypeStruct((G, padded_params["l3_w"].shape[-1]), jnp.float32),
        ),
        in_specs=[vmem] * 14,
        out_specs=(vmem, vmem),
    )(adj_bd, x,
      padded_params["gc1_w"], padded_params["gc1_b"],
      padded_params["gc2_w"], padded_params["gc2_b"],
      pool1, pool2,
      padded_params["l1_w"], padded_params["l1_b"],
      padded_params["l2_w"], padded_params["l2_b"],
      padded_params["l3_w"], padded_params["l3_b"])
    return out_l1, out_l3


# ----------------------------------------------------------------------------
# Parameter helpers: deterministic params, one-time zero-padding to 128 lanes.
# Padding is exact: padded weight rows/cols and bias lanes are zero.
# ----------------------------------------------------------------------------
def glorot(key, shape):
    fan_in, fan_out = shape
    lim = jnp.sqrt(6.0 / (fan_in + fan_out))
    return jax.random.uniform(key, shape, jnp.float32, -lim, lim)


def make_params(key, nfeat, nhid):
    ks = jax.random.split(key, 6)
    return {
        "gc1_w": glorot(ks[0], (nfeat, nhid)),
        "gc1_b": jnp.zeros((1, nhid), jnp.float32),
        "gc2_w": glorot(ks[1], (nhid, nhid)),
        "gc2_b": jnp.zeros((1, nhid), jnp.float32),
        "l1_w": glorot(ks[2], (nhid, 512)),
        "l1_b": jnp.zeros((1, 512), jnp.float32),
        "l2_w": glorot(ks[3], (512, 128)),
        "l2_b": jnp.zeros((1, 128), jnp.float32),
        "l3_w": glorot(ks[4], (128, 2)),
        "l3_b": jnp.zeros((1, 2), jnp.float32),
    }


def pad_params(params):
    nfeat, nhid = params["gc1_w"].shape
    Fp, Hp = _round_up(nfeat), _round_up(nhid)
    return {
        "gc1_w": _pad2d(params["gc1_w"], Fp, Hp),
        "gc1_b": _pad2d(params["gc1_b"], 1, Hp),
        "gc2_w": _pad2d(params["gc2_w"], Hp, Hp),
        "gc2_b": _pad2d(params["gc2_b"], 1, Hp),
        "l1_w": _pad2d(params["l1_w"], Hp, params["l1_w"].shape[1]),
        "l1_b": params["l1_b"],
        "l2_w": params["l2_w"],
        "l2_b": params["l2_b"],
        "l3_w": params["l3_w"],
        "l3_b": params["l3_b"],
    }


def make_norm_adj(key, G, N):
    """Random symmetric graphs with self-loops, D^{-1/2} A D^{-1/2} normalized."""
    a = (jax.random.uniform(key, (G, N, N)) > 0.7).astype(jnp.float32)
    a = jnp.maximum(a, jnp.transpose(a, (0, 2, 1)))                  # symmetric
    a = jnp.maximum(a, jnp.eye(N, dtype=jnp.float32)[None])          # self-loops
    deg = jnp.sum(a, axis=-1)                                        # (G, N)
    d_inv_sqrt = 1.0 / jnp.sqrt(jnp.maximum(deg, 1.0))
    return a * d_inv_sqrt[:, :, None] * d_inv_sqrt[:, None, :]


# Pure-JAX reference (same dense-adjacency model) for a correctness check.
def mygcn_reference(params, adj1, adj2, fea1, fea2):
    def gc(adj, x, w, b):
        return jnp.maximum(jnp.einsum("gnm,gmf->gnf", adj, x @ w) + b, 0.0)
    f1 = gc(adj1, fea1, params["gc1_w"], params["gc1_b"])
    f2 = gc(adj2, fea2, params["gc1_w"], params["gc1_b"])
    f1 = gc(adj1, f1, params["gc2_w"], params["gc2_b"])
    f2 = gc(adj2, f2, params["gc2_w"], params["gc2_b"])
    hg = f1.mean(axis=1) * f2.mean(axis=1)
    l1 = hg @ params["l1_w"] + params["l1_b"]
    l2 = l1 @ params["l2_w"] + params["l2_b"]
    l3 = l2 @ params["l3_w"] + params["l3_b"]
    return l1, l3


if __name__ == "__main__":
    nfeat, nhid = 33, 32
    G, N = 2, 16   # 2 graphs per batch (per branch), 16 nodes each

    key = jax.random.PRNGKey(0)
    k_par, k_a1, k_a2, k_f1, k_f2 = jax.random.split(key, 5)

    params = make_params(k_par, nfeat, nhid)
    padded_params = pad_params(params)
    adj1 = make_norm_adj(k_a1, G, N)
    adj2 = make_norm_adj(k_a2, G, N)
    fea1 = jax.random.normal(k_f1, (G, N, nfeat), jnp.float32)
    fea2 = jax.random.normal(k_f2, (G, N, nfeat), jnp.float32)

    l1, l3 = mygcn_forward(padded_params, adj1, adj2, fea1, fea2)
    jax.block_until_ready((l1, l3))
    assert l1.shape == (G, 512) and l3.shape == (G, 2)

    l1_ref, l3_ref = mygcn_reference(params, adj1, adj2, fea1, fea2)
    assert jnp.allclose(l1, l1_ref, atol=1e-4, rtol=1e-4)
    assert jnp.allclose(l3, l3_ref, atol=1e-4, rtol=1e-4)
    print("KERNEL_OK")
</pallas_src>

<mosaic_0001>
module attributes {stable_mosaic.version = 11 : i64} {
  func.func @mygcn_fused_kernel(%arg0: memref<64x64xf32, #tpu.memory_space<vmem>>, %arg1: memref<64x128xf32, #tpu.memory_space<vmem>>, %arg2: memref<128x128xf32, #tpu.memory_space<vmem>>, %arg3: memref<1x128xf32, #tpu.memory_space<vmem>>, %arg4: memref<128x128xf32, #tpu.memory_space<vmem>>, %arg5: memref<1x128xf32, #tpu.memory_space<vmem>>, %arg6: memref<2x64xf32, #tpu.memory_space<vmem>>, %arg7: memref<2x64xf32, #tpu.memory_space<vmem>>, %arg8: memref<128x512xf32, #tpu.memory_space<vmem>>, %arg9: memref<1x512xf32, #tpu.memory_space<vmem>>, %arg10: memref<512x128xf32, #tpu.memory_space<vmem>>, %arg11: memref<1x128xf32, #tpu.memory_space<vmem>>, %arg12: memref<128x2xf32, #tpu.memory_space<vmem>>, %arg13: memref<1x2xf32, #tpu.memory_space<vmem>>, %arg14: memref<2x512xf32, #tpu.memory_space<vmem>>, %arg15: memref<2x2xf32, #tpu.memory_space<vmem>>) attributes {dimension_semantics = [], scalar_prefetch = 0 : i64, scratch_operands = 0 : i64, tpu.core_type = #tpu.core_type<tc>} {
    %c0 = arith.constant 0 : index
    %c0_0 = arith.constant 0 : index
    %0 = vector.load %arg0[%c0, %c0_0] : memref<64x64xf32, #tpu.memory_space<vmem>>, vector<64x64xf32>
    %c0_1 = arith.constant 0 : index
    %c0_2 = arith.constant 0 : index
    %1 = vector.load %arg1[%c0_1, %c0_2] : memref<64x128xf32, #tpu.memory_space<vmem>>, vector<64x128xf32>
    %c0_3 = arith.constant 0 : index
    %c0_4 = arith.constant 0 : index
    %2 = vector.load %arg2[%c0_3, %c0_4] : memref<128x128xf32, #tpu.memory_space<vmem>>, vector<128x128xf32>
    %cst = arith.constant dense<0.000000e+00> : vector<64x128xf32>
    %3 = tpu.matmul %1, %2, %cst {dimension_numbers = #tpu.dot_dimension_numbers<[1], [0], [0], [1], [0, 0, 1, 1], [], []>} : vector<64x128xf32>, vector<128x128xf32>, vector<64x128xf32> -> vector<64x128xf32>
    %cst_5 = arith.constant dense<0.000000e+00> : vector<64x128xf32>
    %4 = tpu.matmul %0, %3, %cst_5 {dimension_numbers = #tpu.dot_dimension_numbers<[1], [0], [0], [1], [0, 0, 1, 1], [], []>} : vector<64x64xf32>, vector<64x128xf32>, vector<64x128xf32> -> vector<64x128xf32>
    %c0_6 = arith.constant 0 : index
    %c0_7 = arith.constant 0 : index
    %5 = vector.load %arg3[%c0_6, %c0_7] : memref<1x128xf32, #tpu.memory_space<vmem>>, vector<1x128xf32>
    %6 = vector.broadcast %5 : vector<1x128xf32> to vector<64x128xf32>
    %7 = arith.addf %4, %6 : vector<64x128xf32>
    %cst_8 = arith.constant 0.000000e+00 : f32
    %8 = vector.broadcast %cst_8 : f32 to vector<64x128xf32>
    %9 = arith.maximumf %7, %8 : vector<64x128xf32>
    %c0_9 = arith.constant 0 : index
    %c0_10 = arith.constant 0 : index
    %10 = vector.load %arg4[%c0_9, %c0_10] : memref<128x128xf32, #tpu.memory_space<vmem>>, vector<128x128xf32>
    %cst_11 = arith.constant dense<0.000000e+00> : vector<64x128xf32>
    %11 = tpu.matmul %9, %10, %cst_11 {dimension_numbers = #tpu.dot_dimension_numbers<[1], [0], [0], [1], [0, 0, 1, 1], [], []>} : vector<64x128xf32>, vector<128x128xf32>, vector<64x128xf32> -> vector<64x128xf32>
    %cst_12 = arith.constant dense<0.000000e+00> : vector<64x128xf32>
    %12 = tpu.matmul %0, %11, %cst_12 {dimension_numbers = #tpu.dot_dimension_numbers<[1], [0], [0], [1], [0, 0, 1, 1], [], []>} : vector<64x64xf32>, vector<64x128xf32>, vector<64x128xf32> -> vector<64x128xf32>
    %c0_13 = arith.constant 0 : index
    %c0_14 = arith.constant 0 : index
    %13 = vector.load %arg5[%c0_13, %c0_14] : memref<1x128xf32, #tpu.memory_space<vmem>>, vector<1x128xf32>
    %14 = vector.broadcast %13 : vector<1x128xf32> to vector<64x128xf32>
    %15 = arith.addf %12, %14 : vector<64x128xf32>
    %cst_15 = arith.constant 0.000000e+00 : f32
    %16 = vector.broadcast %cst_15 : f32 to vector<64x128xf32>
    %17 = arith.maximumf %15, %16 : vector<64x128xf32>
    %c0_16 = arith.constant 0 : index
    %c0_17 = arith.constant 0 : index
    %18 = vector.load %arg6[%c0_16, %c0_17] : memref<2x64xf32, #tpu.memory_space<vmem>>, vector<2x64xf32>
    %cst_18 = arith.constant dense<0.000000e+00> : vector<2x128xf32>
    %19 = tpu.matmul %18, %17, %cst_18 {dimension_numbers = #tpu.dot_dimension_numbers<[1], [0], [0], [1], [0, 0, 1, 1], [], []>} : vector<2x64xf32>, vector<64x128xf32>, vector<2x128xf32> -> vector<2x128xf32>
    %c0_19 = arith.constant 0 : index
    %c0_20 = arith.constant 0 : index
    %20 = vector.load %arg7[%c0_19, %c0_20] : memref<2x64xf32, #tpu.memory_space<vmem>>, vector<2x64xf32>
    %cst_21 = arith.constant dense<0.000000e+00> : vector<2x128xf32>
    %21 = tpu.matmul %20, %17, %cst_21 {dimension_numbers = #tpu.dot_dimension_numbers<[1], [0], [0], [1], [0, 0, 1, 1], [], []>} : vector<2x64xf32>, vector<64x128xf32>, vector<2x128xf32> -> vector<2x128xf32>
    %22 = arith.mulf %19, %21 : vector<2x128xf32>
    %c0_22 = arith.constant 0 : index
    %c0_23 = arith.constant 0 : index
    %23 = vector.load %arg8[%c0_22, %c0_23] : memref<128x512xf32, #tpu.memory_space<vmem>>, vector<128x512xf32>
    %cst_24 = arith.constant dense<0.000000e+00> : vector<2x512xf32>
    %24 = tpu.matmul %22, %23, %cst_24 {dimension_numbers = #tpu.dot_dimension_numbers<[1], [0], [0], [1], [0, 0, 1, 1], [], []>} : vector<2x128xf32>, vector<128x512xf32>, vector<2x512xf32> -> vector<2x512xf32>
    %c0_25 = arith.constant 0 : index
    %c0_26 = arith.constant 0 : index
    %25 = vector.load %arg9[%c0_25, %c0_26] : memref<1x512xf32, #tpu.memory_space<vmem>>, vector<1x512xf32>
    %26 = vector.broadcast %25 : vector<1x512xf32> to vector<2x512xf32>
    %27 = arith.addf %24, %26 : vector<2x512xf32>
    %c0_27 = arith.constant 0 : index
    %c0_28 = arith.constant 0 : index
    %28 = vector.load %arg10[%c0_27, %c0_28] : memref<512x128xf32, #tpu.memory_space<vmem>>, vector<512x128xf32>
    %cst_29 = arith.constant dense<0.000000e+00> : vector<2x128xf32>
    %29 = tpu.matmul %27, %28, %cst_29 {dimension_numbers = #tpu.dot_dimension_numbers<[1], [0], [0], [1], [0, 0, 1, 1], [], []>} : vector<2x512xf32>, vector<512x128xf32>, vector<2x128xf32> -> vector<2x128xf32>
    %c0_30 = arith.constant 0 : index
    %c0_31 = arith.constant 0 : index
    %30 = vector.load %arg11[%c0_30, %c0_31] : memref<1x128xf32, #tpu.memory_space<vmem>>, vector<1x128xf32>
    %31 = vector.broadcast %30 : vector<1x128xf32> to vector<2x128xf32>
    %32 = arith.addf %29, %31 : vector<2x128xf32>
    %c0_32 = arith.constant 0 : index
    %c0_33 = arith.constant 0 : index
    %33 = vector.load %arg12[%c0_32, %c0_33] : memref<128x2xf32, #tpu.memory_space<vmem>>, vector<128x2xf32>
    %cst_34 = arith.constant dense<0.000000e+00> : vector<2x2xf32>
    %34 = tpu.matmul %32, %33, %cst_34 {dimension_numbers = #tpu.dot_dimension_numbers<[1], [0], [0], [1], [0, 0, 1, 1], [], []>} : vector<2x128xf32>, vector<128x2xf32>, vector<2x2xf32> -> vector<2x2xf32>
    %c0_35 = arith.constant 0 : index
    %c0_36 = arith.constant 0 : index
    %35 = vector.load %arg13[%c0_35, %c0_36] : memref<1x2xf32, #tpu.memory_space<vmem>>, vector<1x2xf32>
    %36 = vector.broadcast %35 : vector<1x2xf32> to vector<2x2xf32>
    %37 = arith.addf %34, %36 : vector<2x2xf32>
    %c0_37 = arith.constant 0 : index
    %c0_38 = arith.constant 0 : index
    %38 = vector.load %arg14[%c0_37, %c0_38] : memref<2x512xf32, #tpu.memory_space<vmem>>, vector<2x512xf32>
    tpu.vector_store %arg14[%c0_37, %c0_38], %27 {strides = array<i32>} : memref<2x512xf32, #tpu.memory_space<vmem>>, vector<2x512xf32>,
    %c0_39 = arith.constant 0 : index
    %c0_40 = arith.constant 0 : index
    %39 = vector.load %arg15[%c0_39, %c0_40] : memref<2x2xf32, #tpu.memory_space<vmem>>, vector<2x2xf32>
    tpu.vector_store %arg15[%c0_39, %c0_40], %37 {strides = array<i32>} : memref<2x2xf32, #tpu.memory_space<vmem>>, vector<2x2xf32>,
    return
  }
}

</mosaic_0001>

<bundles_post_ra>
// kernel: mygcn_forward.1
= control target key start
LH: loop header
LB: loop body
LE: loop exit
PB: predicated region body
PF: predicated region fallthrough
CT: control target
= control target key end

     0   :  { %21 = vsyncpa [#allocation3], 0  ;;  %s1429_s0 = inlined_call_operand.vmem [shape: f32[64,64], index: 0, kind: input, shape index: {}]   ;;  %s1430_s1 = inlined_call_operand.vmem [shape: f32[64,128], index: 1, kind: input, shape index: {}]   ;;  %s1431_s2 = inlined_call_operand.vmem [shape: f32[128,128], index: 2, kind: input, shape index: {}]   ;;  %s1432_s3 = inlined_call_operand.vmem [shape: f32[1,128], index: 3, kind: input, shape index: {}]   ;;  %s1433_s4 = inlined_call_operand.vmem [shape: f32[128,128], index: 4, kind: input, shape index: {}]   ;;  %s1434_s5 = inlined_call_operand.vmem [shape: f32[1,128], index: 5, kind: input, shape index: {}]   ;;  %s1435_s6 = inlined_call_operand.vmem [shape: f32[2,64], index: 6, kind: input, shape index: {}]   ;;  %s1436_s7 = inlined_call_operand.vmem [shape: f32[2,64], index: 7, kind: input, shape index: {}]   ;;  %s1437_s8 = inlined_call_operand.vmem [shape: f32[128,512], index: 8, kind: input, shape index: {}]   ;;  %s1438_s9 = inlined_call_operand.vmem [shape: f32[1,512], index: 9, kind: input, shape index: {}]   ;;  %s1439_s10 = inlined_call_operand.hbm [shape: f32[512,128], index: 10, kind: input, shape index: {}]   ;;  %s1440_s11 = inlined_call_operand.vmem [shape: f32[1,128], index: 11, kind: input, shape index: {}]   ;;  %s1441_s12 = inlined_call_operand.vmem [shape: f32[128,2], index: 12, kind: input, shape index: {}]   ;;  %s1442_s13 = inlined_call_operand.vmem [shape: f32[1,2], index: 13, kind: input, shape index: {}]   ;;  %s1443_s14 = inlined_call_operand.hbm [shape: f32[2,512], index: 14, kind: output, shape index: {0}]   ;;  %s1444_s15 = inlined_call_operand.hbm [shape: f32[2,2], index: 15, kind: output, shape index: {1}]  }
   0x1   :  { %22 = vsyncpa [#allocation4], 0 }
   0x2   :  { %23 = vsyncpa [#allocation7], 0  ;;  %s48_s20 = sshll.u32 %s1439_s10, 4  ;;  %s874_s21 = smov [#allocation2]   ;;  %s49_s20 = int_to_ptr.hbm [resolvable:$true] %s48_s20 }
   0x3   :  { %s50_s22 = sshll.u32 %s874_s21, 4  ;;  %s875_s23 = smov 128   ;;  %s51_s22 = int_to_ptr.vmem [resolvable:$true] %s50_s22 }
   0x4   :  { %s876_s24 = smov 8  }
   0x5   :  { %56 = dma.hbm_to_vmem [thread:$0]  %s49_s20, 8192, %s51_s22, [#allocation3], %s875_s23, %s875_s23, %s876_s24  }
   0x6   :  { %868 = dma.done.wait [#allocation3], 8192  }
   0x7   :  { %869 = vsyncadd [#allocation3], 4294959104  ;;  %v98_v0 = vld [vmem:[%s1431_s2 + $0x78] sm:$0xff]  ;;  %v97_v1 = vld [vmem:[%s1431_s2 + $0x70] sm:$0xff]  ;;  %vm144_vm0 = vcmask 523264   ;;  %vm726_vm1 = vcmask 1041408  }
   0x8   :  { %99 = vmatpush.msra.mxu0 %v98_v0  ;;  %v96_v2 = vld [vmem:[%s1431_s2 + $0x68] sm:$0xff]  ;;  %v95_v3 = vld [vmem:[%s1431_s2 + $0x60] sm:$0xff]  ;;  %v94_v4 = vld [vmem:[%s1431_s2 + $0x58] sm:$0xff]  ;;  %vm728_vm2 = vcmask 1045508   ;;  %vm730_vm3 = vcmask 1043456   ;;  %s743_s23 = sshll.u32 %s1443_s14, 4  ;;  %s744_s23 = int_to_ptr.hbm [resolvable:$true] %s743_s23 }
   0x9   :  { %v93_v5 = vld [vmem:[%s1431_s2 + $0x50] sm:$0xff]  ;;  %v92_v6 = vld [vmem:[%s1431_s2 + $0x48] sm:$0xff]  ;;  %v91_v7 = vld [vmem:[%s1431_s2 + $0x40] sm:$0xff]  ;;  %s877_s24 = smov [#allocation5]   ;;  %s754_s28 = sshll.u32 %s1444_s15, 4  ;;  %vm734_vm4 = vcmask 9216   ;;  %s755_s28 = int_to_ptr.hbm [resolvable:$true] %s754_s28 }
   0xa   :  { %100 = vmatpush.msra.mxu0 %v97_v1  ;;  %v90_v8 = vld [vmem:[%s1431_s2 + $0x38] sm:$0xff]  ;;  %v89_v9 = vld [vmem:[%s1431_s2 + $0x30] sm:$0xff]  ;;  %v88_v10 = vld [vmem:[%s1431_s2 + $0x28] sm:$0xff]  ;;  %s741_s25 = sshll.u32 %s877_s24, 4  ;;  %s742_s25 = int_to_ptr.vmem [resolvable:$true] %s741_s25 }
   0xb   :  { %v87_v11 = vld [vmem:[%s1431_s2 + $0x20] sm:$0xff]  ;;  %v86_v12 = vld [vmem:[%s1431_s2 + $0x18] sm:$0xff]  ;;  %v85_v13 = vld [vmem:[%s1431_s2 + $0x10] sm:$0xff] }
   0xc   :  { %101 = vmatpush.msra.mxu0 %v96_v2  ;;  %v84_v14 = vld [vmem:[%s1431_s2 + $0x8] sm:$0xff]  ;;  %v83_v15 = vld [vmem:[%s1431_s2] sm:$0xff]  ;;  %v77_v18 = vld [vmem:[%s1430_s1 + $0x10] sm:$0xff] }
   0xd   :  { %v75_v16 = vld [vmem:[%s1430_s1] sm:$0xff]  ;;  %v76_v17 = vld [vmem:[%s1430_s1 + $0x8] sm:$0xff]  ;;  %v78_v19 = vld [vmem:[%s1430_s1 + $0x18] sm:$0xff] }
   0xe   :  { %102 = vmatpush.msra.mxu0 %v95_v3  ;;  %v79_v20 = vld [vmem:[%s1430_s1 + $0x20] sm:$0xff]  ;;  %v80_v21 = vld [vmem:[%s1430_s1 + $0x28] sm:$0xff]  ;;  %v81_v22 = vld [vmem:[%s1430_s1 + $0x30] sm:$0xff] }
   0xf   :  { %v82_v23 = vld [vmem:[%s1430_s1 + $0x38] sm:$0xff]  ;;  %v1037_v32 = vld [vmem:[%s1429_s0] sm:$0xff]  ;;  %v1044_v33 = vld [vmem:[%s1429_s0 + $0x8] sm:$0xff]  ;;  %s878_s1 = smov [#allocation6]  }
  0x10   :  { %103 = vmatpush.msra.mxu0 %v94_v4  ;;  %v1051_v34 = vld [vmem:[%s1429_s0 + $0x10] sm:$0xff]  ;;  %v1058_v35 = vld [vmem:[%s1429_s0 + $0x18] sm:$0xff]  ;;  %v231_v38 = vld [vmem:[%s1433_s4 + $0x68] sm:$0xff]  ;;  %s752_s26 = sshll.u32 %s878_s1, 4  ;;  %s753_s26 = int_to_ptr.vmem [resolvable:$true] %s752_s26 }
  0x11   :  { %v233_v36 = vld [vmem:[%s1433_s4 + $0x78] sm:$0xff]  ;;  %v232_v37 = vld [vmem:[%s1433_s4 + $0x70] sm:$0xff]  ;;  %v230_v39 = vld [vmem:[%s1433_s4 + $0x60] sm:$0xff] }
  0x12   :  { %104 = vmatpush.msra.mxu0 %v93_v5  ;;  %234 = vmatpush.msra.mxu2 %v233_v36  ;;  %v1077_v40 = vld [vmem:[%s1429_s0 + $0x20] sm:$0xff]  ;;  %v229_v41 = vld [vmem:[%s1433_s4 + $0x58] sm:$0xff]  ;;  %v228_v42 = vld [vmem:[%s1433_s4 + $0x50] sm:$0xff] }
  0x13   :  { %v227_v43 = vld [vmem:[%s1433_s4 + $0x48] sm:$0xff]  ;;  %v226_v44 = vld [vmem:[%s1433_s4 + $0x40] sm:$0xff]  ;;  %v225_v46 = vld [vmem:[%s1433_s4 + $0x38] sm:$0xff] }
  0x14   :  { %105 = vmatpush.msra.mxu0 %v92_v6  ;;  %235 = vmatpush.msra.mxu2 %v232_v37  ;;  %v1096_v45 = vld [vmem:[%s1429_s0 + $0x28] sm:$0xff]  ;;  %v224_v47 = vld [vmem:[%s1433_s4 + $0x30] sm:$0xff]  ;;  %v222_v49 = vld [vmem:[%s1433_s4 + $0x20] sm:$0xff] }
  0x15   :  { %v223_v48 = vld [vmem:[%s1433_s4 + $0x28] sm:$0xff]  ;;  %v1115_v50 = vld [vmem:[%s1429_s0 + $0x30] sm:$0xff]  ;;  %v221_v51 = vld [vmem:[%s1433_s4 + $0x18] sm:$0xff] }
  0x16   :  { %106 = vmatpush.msra.mxu0 %v91_v7  ;;  %236 = vmatpush.msra.mxu2 %v231_v38  ;;  %v1125_v52 = vld [vmem:[%s1429_s0 + $0x38] sm:$0xff]  ;;  %v220_v53 = vld [vmem:[%s1433_s4 + $0x10] sm:$0xff]  ;;  %v219_v54 = vld [vmem:[%s1433_s4 + $0x8] sm:$0xff] }
  0x17   :  { %v218_v55 = vld [vmem:[%s1433_s4] sm:$0xff]  ;;  %v426_v38 = vld [vmem:[%s1437_s8 + $0x188] sm:$0xff] }
  0x18   :  { %107 = vmatpush.msra.mxu0 %v90_v8  ;;  %237 = vmatpush.msra.mxu2 %v230_v39  ;;  %v792_v56 = vld [vmem:[%s1432_s3] ss:$0 sm:$0xff] }
  0x19   :  { %v429_v36 = vld [vmem:[%s1437_s8 + $0x1a0] sm:$0xff] }
  0x1a   :  { %108 = vmatpush.msra.mxu0 %v89_v9  ;;  %238 = vmatpush.msra.mxu2 %v229_v41  ;;  %v425_v39 = vld [vmem:[%s1437_s8 + $0x180] sm:$0xff] }
  0x1b   :  { %v421_v41 = vld [vmem:[%s1437_s8 + $0x160] sm:$0xff] }
  0x1c   :  { %109 = vmatpush.msra.mxu0 %v88_v10  ;;  %239 = vmatpush.msra.mxu2 %v228_v42  ;;  %v418_v42 = vld [vmem:[%s1437_s8 + $0x148] sm:$0xff] }
  0x1e   :  { %110 = vmatpush.msra.mxu0 %v87_v11  ;;  %240 = vmatpush.msra.mxu2 %v227_v43  ;;  %v417_v43 = vld [vmem:[%s1437_s8 + $0x140] sm:$0xff] }
  0x20   :  { %111 = vmatpush.msra.mxu0 %v86_v12  ;;  %241 = vmatpush.msra.mxu2 %v226_v44  ;;  %v414_v44 = vld [vmem:[%s1437_s8 + $0x128] sm:$0xff] }
  0x22   :  { %112 = vmatpush.msra.mxu0 %v85_v13  ;;  %242 = vmatpush.msra.mxu2 %v225_v46  ;;  %v413_v46 = vld [vmem:[%s1437_s8 + $0x120] sm:$0xff] }
  0x24   :  { %113 = vmatpush.msra.mxu0 %v84_v14  ;;  %243 = vmatpush.msra.mxu2 %v224_v47 }
  0x26   :  { %114 = vmatpush.msra.mxu0 %v83_v15  ;;  %244 = vmatpush.msra.mxu2 %v223_v48  ;;  %v410_v48 = vld [vmem:[%s1437_s8 + $0x108] sm:$0xff] }
  0x27   :  { %115 = vmatmul.f32.vlgmr.msra.gmra.mxu0 %v75_v16 }
  0x28   :  { %245 = vmatpush.msra.mxu2 %v222_v49 }
  0x2a   :  { %246 = vmatpush.msra.mxu2 %v221_v51 }
  0x2c   :  { %247 = vmatpush.msra.mxu2 %v220_v53  ;;  %v406_v53 = vld [vmem:[%s1437_s8 + $0xe8] sm:$0xff] }
  0x2e   :  { %248 = vmatpush.msra.mxu2 %v219_v54  ;;  %v409_v54 = vld [vmem:[%s1437_s8 + $0x100] sm:$0xff] }
  0x2f   :  { %118 = vmatmul.f32.gmra.mxu0 %v76_v17 }
  0x30   :  { %249 = vmatpush.msra.mxu2 %v218_v55 }
  0x37   :  { %121 = vmatmul.f32.gmra.mxu0 %v77_v18 }
  0x3f   :  { %124 = vmatmul.f32.gmra.mxu0 %v78_v19 }
  0x47   :  { %127 = vmatmul.f32.gmra.mxu0 %v79_v20 }
  0x4f   :  { %130 = vmatmul.f32.gmra.mxu0 %v80_v21 }
  0x57   :  { %133 = vmatmul.f32.gmra.mxu0 %v81_v22 }
  0x5f   :  { %136 = vmatmul.f32.gmra.mxu0 %v82_v23 }
  0xa4   :  { %v116_v24 = vpop.f32.mrf.mxu0 }
  0xac   :  { %v119_v25 = vpop.f32.mrf.mxu0 }
  0xb4   :  { %v122_v26 = vpop.f32.mrf.mxu0 }
  0xbc   :  { %v125_v27 = vpop.f32.mrf.mxu0 }
  0xc4   :  { %v128_v28 = vpop.f32.mrf.mxu0 }
  0xcc   :  { %v131_v29 = vpop.f32.mrf.mxu0 }
  0xd4   :  { %v134_v30 = vpop.f32.mrf.mxu0 }
  0xdc   :  { %v137_v31 = vpop.f32.mrf.mxu0 }
  0xdd   :  { %177 = vmatpush.msra.mxu1 %v137_v31  ;;  %v438_v31 = vld [vmem:[%s1437_s8 + $0x1e8] sm:$0xff] }
  0xde   :  { %471 = vmatpush.msrb.mxu2 %v438_v31  ;;  %v396_v31 = vld [vmem:[%s1437_s8 + $0x98] sm:$0xff] }
  0xdf   :  { %178 = vmatpush.msra.mxu1 %v134_v30 }
  0xe1   :  { %179 = vmatpush.msra.mxu1 %v131_v29 }
  0xe3   :  { %180 = vmatpush.msra.mxu1 %v128_v28 }
  0xe5   :  { %181 = vmatpush.msra.mxu1 %v125_v27 }
  0xe7   :  { %182 = vmatpush.msra.mxu1 %v122_v26 }
  0xe9   :  { %183 = vmatpush.msra.mxu1 %v119_v25 }
  0xeb   :  { %184 = vmatpush.msra.mxu1 %v116_v24 }
  0xec   :  { %769 = vmatmul.msk.f32.vlgmr.msra.gmra.mxu1 %vm144_vm0, %v1037_v32 }
  0xf4   :  { %770 = vmatmul.msk.f32.gmra.mxu1 %vm144_vm0, %v1044_v33 }
  0xfc   :  { %771 = vmatmul.msk.f32.gmra.mxu1 %vm144_vm0, %v1051_v34 }
 0x104   :  { %772 = vmatmul.msk.f32.gmra.mxu1 %vm144_vm0, %v1058_v35 }
 0x10c   :  { %773 = vmatmul.msk.f32.gmra.mxu1 %vm144_vm0, %v1077_v40 }
 0x114   :  { %774 = vmatmul.msk.f32.gmra.mxu1 %vm144_vm0, %v1096_v45 }
 0x11c   :  { %775 = vmatmul.msk.f32.gmra.mxu1 %vm144_vm0, %v1115_v50 }
 0x124   :  { %776 = vmatmul.msk.f32.gmra.mxu1 %vm144_vm0, %v1125_v52 }
 0x169   :  { %v186_v57 = vpop.f32.mrf.mxu1 }
 0x16a   :  { %v187_v58 = vadd.f32 %v792_v56, %v186_v57  ;;  %v402_v57 = vld [vmem:[%s1437_s8 + $0xc8] sm:$0xff] }
 0x16c   :  { %v210_v59 = vmax.f32 %v187_v58, 0.0 }
 0x16e   :  { %250 = vmatmul.f32.vlgmr.msra.gmra.mxu2 %v210_v59 }
 0x171   :  { %v189_v60 = vpop.f32.mrf.mxu1 }
 0x172   :  { %v190_v61 = vadd.f32 %v792_v56, %v189_v60  ;;  %v398_v60 = vld [vmem:[%s1437_s8 + $0xa8] sm:$0xff] }
 0x174   :  { %v211_v62 = vmax.f32 %v190_v61, 0.0  ;;  %v405_v61 = vld [vmem:[%s1437_s8 + $0xe0] sm:$0xff] }
 0x176   :  { %253 = vmatmul.f32.gmra.mxu2 %v211_v62 }
 0x179   :  { %v192_v63 = vpop.f32.mrf.mxu1 }
 0x17a   :  { %v193_v0 = vadd.f32 %v792_v56, %v192_v63 }
 0x17c   :  { %v212_v1 = vmax.f32 %v193_v0, 0.0  ;;  %v394_v0 = vld [vmem:[%s1437_s8 + $0x88] sm:$0xff] }
 0x17e   :  { %256 = vmatmul.f32.gmra.mxu2 %v212_v1 }
 0x181   :  { %v195_v2 = vpop.f32.mrf.mxu1 }
 0x182   :  { %v196_v3 = vadd.f32 %v792_v56, %v195_v2 }
 0x184   :  { %v213_v4 = vmax.f32 %v196_v3, 0.0  ;;  %v390_v3 = vld [vmem:[%s1437_s8 + $0x68] sm:$0xff] }
 0x186   :  { %259 = vmatmul.f32.gmra.mxu2 %v213_v4  ;;  %v401_v4 = vld [vmem:[%s1437_s8 + $0xc0] sm:$0xff] }
 0x189   :  { %v198_v5 = vpop.f32.mrf.mxu1 }
 0x18a   :  { %v199_v6 = vadd.f32 %v792_v56, %v198_v5 }
 0x18c   :  { %v214_v7 = vmax.f32 %v199_v6, 0.0 }
 0x18e   :  { %262 = vmatmul.f32.gmra.mxu2 %v214_v7  ;;  %v386_v7 = vld [vmem:[%s1437_s8 + $0x48] sm:$0xff] }
 0x191   :  { %v201_v8 = vpop.f32.mrf.mxu1 }
 0x192   :  { %v202_v9 = vadd.f32 %v792_v56, %v201_v8 }
 0x194   :  { %v215_v10 = vmax.f32 %v202_v9, 0.0 }
 0x196   :  { %265 = vmatmul.f32.gmra.mxu2 %v215_v10  ;;  %v352_v10 = vld [vmem:[%s1436_s7] sm:$0x3] }
 0x199   :  { %v204_v11 = vpop.f32.mrf.mxu1 }
 0x19a   :  { %v205_v12 = vadd.f32 %v792_v56, %v204_v11  ;;  %v328_v11 = vld [vmem:[%s1435_s6] sm:$0x3] }
 0x19c   :  { %v216_v13 = vmax.f32 %v205_v12, 0.0  ;;  %v440_v12 = vld [vmem:[%s1437_s8 + $0x1f8] sm:$0xff] }
 0x19e   :  { %268 = vmatmul.f32.gmra.mxu2 %v216_v13  ;;  %v439_v13 = vld [vmem:[%s1437_s8 + $0x1f0] sm:$0xff] }
 0x1a1   :  { %v207_v14 = vpop.f32.mrf.mxu1 }
 0x1a2   :  { %v208_v15 = vadd.f32 %v792_v56, %v207_v14  ;;  %v436_v14 = vld [vmem:[%s1437_s8 + $0x1d8] sm:$0xff] }
 0x1a4   :  { %v217_v16 = vmax.f32 %v208_v15, 0.0  ;;  %v435_v15 = vld [vmem:[%s1437_s8 + $0x1d0] sm:$0xff] }
 0x1a6   :  { %271 = vmatmul.f32.gmra.mxu2 %v217_v16  ;;  %v432_v16 = vld [vmem:[%s1437_s8 + $0x1b8] sm:$0xff] }
 0x1f1   :  { %v251_v17 = vpop.f32.mrf.mxu2 }
 0x1f9   :  { %v254_v18 = vpop.f32.mrf.mxu2 }
 0x201   :  { %v257_v19 = vpop.f32.mrf.mxu2 }
 0x209   :  { %v260_v20 = vpop.f32.mrf.mxu2 }
 0x211   :  { %v263_v21 = vpop.f32.mrf.mxu2 }
 0x219   :  { %v266_v22 = vpop.f32.mrf.mxu2 }
 0x221   :  { %v269_v23 = vpop.f32.mrf.mxu2 }
 0x229   :  { %v272_v24 = vpop.f32.mrf.mxu2 }
 0x22a   :  { %287 = vmatpush.msra.mxu3 %v272_v24  ;;  %v416_v24 = vld [vmem:[%s1437_s8 + $0x138] sm:$0xff] }
 0x22c   :  { %288 = vmatpush.msra.mxu3 %v269_v23  ;;  %v419_v23 = vld [vmem:[%s1437_s8 + $0x150] sm:$0xff] }
 0x22e   :  { %289 = vmatpush.msra.mxu3 %v266_v22  ;;  %v420_v22 = vld [vmem:[%s1437_s8 + $0x158] sm:$0xff] }
 0x230   :  { %290 = vmatpush.msra.mxu3 %v263_v21  ;;  %v423_v21 = vld [vmem:[%s1437_s8 + $0x170] sm:$0xff] }
 0x232   :  { %291 = vmatpush.msra.mxu3 %v260_v20  ;;  %v424_v20 = vld [vmem:[%s1437_s8 + $0x178] sm:$0xff] }
 0x234   :  { %292 = vmatpush.msra.mxu3 %v257_v19  ;;  %v427_v19 = vld [vmem:[%s1437_s8 + $0x190] sm:$0xff] }
 0x236   :  { %293 = vmatpush.msra.mxu3 %v254_v18  ;;  %v428_v18 = vld [vmem:[%s1437_s8 + $0x198] sm:$0xff] }
 0x238   :  { %294 = vmatpush.msra.mxu3 %v251_v17  ;;  %v431_v17 = vld [vmem:[%s1437_s8 + $0x1b0] sm:$0xff] }
 0x239   :  { %777 = vmatmul.msk.f32.vlgmr.msra.gmra.mxu3 %vm144_vm0, %v1037_v32  ;;  %v434_v32 = vld [vmem:[%s1437_s8 + $0x1c8] sm:$0xff] }
 0x23a   :  { %472 = vmatpush.msrb.mxu2 %v434_v32  ;;  %v407_v32 = vld [vmem:[%s1437_s8 + $0xf0] sm:$0xff] }
 0x241   :  { %778 = vmatmul.msk.f32.gmra.mxu3 %vm144_vm0, %v1044_v33  ;;  %v437_v33 = vld [vmem:[%s1437_s8 + $0x1e0] sm:$0xff] }
 0x242   :  { %451 = vmatpush.msrb.mxu0 %v437_v33  ;;  %v403_v33 = vld [vmem:[%s1437_s8 + $0xd0] sm:$0xff] }
 0x249   :  { %779 = vmatmul.msk.f32.gmra.mxu3 %vm144_vm0, %v1051_v34  ;;  %v430_v34 = vld [vmem:[%s1437_s8 + $0x1a8] sm:$0xff] }
 0x24a   :  { %473 = vmatpush.msrb.mxu2 %v430_v34  ;;  %v397_v34 = vld [vmem:[%s1437_s8 + $0xa0] sm:$0xff] }
 0x24c   :  { %474 = vmatpush.msrb.mxu2 %v426_v38  ;;  %v392_v38 = vld [vmem:[%s1437_s8 + $0x78] sm:$0xff] }
 0x251   :  { %780 = vmatmul.msk.f32.gmra.mxu3 %vm144_vm0, %v1058_v35  ;;  %v433_v35 = vld [vmem:[%s1437_s8 + $0x1c0] sm:$0xff] }
 0x252   :  { %452 = vmatpush.msrb.mxu0 %v433_v35  ;;  %v399_v35 = vld [vmem:[%s1437_s8 + $0xb0] sm:$0xff] }
 0x254   :  { %453 = vmatpush.msrb.mxu0 %v429_v36  ;;  %v393_v36 = vld [vmem:[%s1437_s8 + $0x80] sm:$0xff] }
 0x256   :  { %454 = vmatpush.msrb.mxu0 %v425_v39  ;;  %v389_v39 = vld [vmem:[%s1437_s8 + $0x60] sm:$0xff] }
 0x258   :  { %455 = vmatpush.msrb.mxu0 %v421_v41  ;;  %v388_v41 = vld [vmem:[%s1437_s8 + $0x58] sm:$0xff] }
 0x259   :  { %781 = vmatmul.msk.f32.gmra.mxu3 %vm144_vm0, %v1077_v40  ;;  %v422_v40 = vld [vmem:[%s1437_s8 + $0x168] sm:$0xff] }
 0x25a   :  { %475 = vmatpush.msrb.mxu2 %v422_v40  ;;  %456 = vmatpush.msrb.mxu0 %v417_v43  ;;  %v391_v40 = vld [vmem:[%s1437_s8 + $0x70] sm:$0xff] }
 0x25b   :  { %v387_v43 = vld [vmem:[%s1437_s8 + $0x50] sm:$0xff] }
 0x25c   :  { %476 = vmatpush.msrb.mxu2 %v418_v42  ;;  %457 = vmatpush.msrb.mxu0 %v413_v46  ;;  %v385_v42 = vld [vmem:[%s1437_s8 + $0x40] sm:$0xff] }
 0x25d   :  { %v381_v46 = vld [vmem:[%s1437_s8 + $0x20] sm:$0xff] }
 0x25e   :  { %477 = vmatpush.msrb.mxu2 %v414_v44  ;;  %458 = vmatpush.msrb.mxu0 %v409_v54  ;;  %v382_v44 = vld [vmem:[%s1437_s8 + $0x28] sm:$0xff]  ;;  %v546_v54 = vld [vmem:[#allocation2 + $0x78] sm:$0xff] }
 0x260   :  { %478 = vmatpush.msrb.mxu2 %v410_v48  ;;  %459 = vmatpush.msrb.mxu0 %v405_v61  ;;  %v378_v48 = vld [vmem:[%s1437_s8 + $0x8] sm:$0xff] }
 0x261   :  { %782 = vmatmul.msk.f32.gmra.mxu3 %vm144_vm0, %v1096_v45  ;;  %v793_v45 = vld [vmem:[%s1434_s5] ss:$0 sm:$0xff]  ;;  %v592_v61 = vld [vmem:[#allocation2 + $0x1e8] sm:$0xff] }
 0x262   :  { %479 = vmatpush.msrb.mxu2 %v406_v53  ;;  %460 = vmatpush.msrb.mxu0 %v401_v4  ;;  %v561_v53 = vld [vmem:[#allocation2 + $0xf0] sm:$0xff]  ;;  %v576_v4 = vld [vmem:[#allocation2 + $0x168] sm:$0xff] }
 0x264   :  { %480 = vmatpush.msrb.mxu2 %v402_v57  ;;  %461 = vmatpush.msrb.mxu0 %v397_v34  ;;  %v560_v57 = vld [vmem:[#allocation2 + $0xe8] sm:$0xff]  ;;  %v550_v34 = vld [vmem:[#allocation2 + $0x98] sm:$0xff] }
 0x266   :  { %481 = vmatpush.msrb.mxu2 %v398_v60  ;;  %462 = vmatpush.msrb.mxu0 %v393_v36  ;;  %v578_v60 = vld [vmem:[#allocation2 + $0x178] sm:$0xff] }
 0x268   :  { %482 = vmatpush.msrb.mxu2 %v394_v0  ;;  %463 = vmatpush.msrb.mxu0 %v389_v39  ;;  %v577_v0 = vld [vmem:[#allocation2 + $0x170] sm:$0xff]  ;;  %v568_v39 = vld [vmem:[#allocation2 + $0x128] sm:$0xff] }
 0x269   :  { %783 = vmatmul.msk.f32.gmra.mxu3 %vm144_vm0, %v1115_v50 }
 0x26a   :  { %483 = vmatpush.msrb.mxu2 %v390_v3  ;;  %464 = vmatpush.msrb.mxu0 %v385_v42  ;;  %v542_v3 = vld [vmem:[#allocation2 + $0x58] sm:$0xff] }
 0x26b   :  { %v566_v42 = vld [vmem:[#allocation2 + $0x118] sm:$0xff] }
 0x26c   :  { %484 = vmatpush.msrb.mxu2 %v386_v7  ;;  %465 = vmatpush.msrb.mxu0 %v381_v46  ;;  %v557_v7 = vld [vmem:[#allocation2 + $0xd0] sm:$0xff]  ;;  %v564_v46 = vld [vmem:[#allocation2 + $0x108] sm:$0xff] }
 0x26e   :  { %485 = vmatpush.msrb.mxu2 %v382_v44  ;;  %v565_v44 = vld [vmem:[#allocation2 + $0x110] sm:$0xff] }
 0x270   :  { %486 = vmatpush.msrb.mxu2 %v378_v48  ;;  %v531_v48 = vld [vmem:[#allocation2] sm:$0xff] }
 0x271   :  { %784 = vmatmul.msk.f32.gmra.mxu3 %vm144_vm0, %v1125_v52 }
 0x2bc   :  { %v1157_v25 = vpop.f32.mrf.mxu3 }
 0x2bd   :  { %v297_v5 = vadd.f32 %v793_v45, %v1157_v25  ;;  %v415_v25 = vld [vmem:[%s1437_s8 + $0x130] sm:$0xff] }
 0x2bf   :  { %v320_v9 = vmax.f32 %v297_v5, 0.0  ;;  %v590_v5 = vld [vmem:[#allocation2 + $0x1d8] sm:$0xff] }
 0x2c4   :  { %v1159_v26 = vpop.f32.mrf.mxu3 }
 0x2c5   :  { %v300_v1 = vadd.f32 %v793_v45, %v1159_v26  ;;  %v412_v26 = vld [vmem:[%s1437_s8 + $0x118] sm:$0xff] }
 0x2c7   :  { %v321_v8 = vmax.f32 %v300_v1, 0.0  ;;  %v591_v1 = vld [vmem:[#allocation2 + $0x1e0] sm:$0xff] }
 0x2cc   :  { %v302_v27 = vpop.f32.mrf.mxu3 }
 0x2cd   :  { %v303_v62 = vadd.f32 %v793_v45, %v302_v27  ;;  %v411_v27 = vld [vmem:[%s1437_s8 + $0x110] sm:$0xff] }
 0x2cf   :  { %v322_v6 = vmax.f32 %v303_v62, 0.0  ;;  %v559_v62 = vld [vmem:[#allocation2 + $0xe0] sm:$0xff] }
 0x2d4   :  { %v305_v28 = vpop.f32.mrf.mxu3 }
 0x2d5   :  { %v306_v58 = vadd.f32 %v793_v45, %v305_v28  ;;  %v408_v28 = vld [vmem:[%s1437_s8 + $0xf8] sm:$0xff] }
 0x2d7   :  { %v323_v2 = vmax.f32 %v306_v58, 0.0  ;;  %v593_v58 = vld [vmem:[#allocation2 + $0x1f0] sm:$0xff] }
 0x2dc   :  { %v308_v29 = vpop.f32.mrf.mxu3 }
 0x2dd   :  { %v309_v55 = vadd.f32 %v793_v45, %v308_v29  ;;  %v404_v29 = vld [vmem:[%s1437_s8 + $0xd8] sm:$0xff] }
 0x2df   :  { %v324_v63 = vmax.f32 %v309_v55, 0.0  ;;  %v594_v55 = vld [vmem:[#allocation2 + $0x1f8] sm:$0xff] }
 0x2e4   :  { %v311_v30 = vpop.f32.mrf.mxu3 }
 0x2e5   :  { %v312_v51 = vadd.f32 %v793_v45, %v311_v30  ;;  %v400_v30 = vld [vmem:[%s1437_s8 + $0xb8] sm:$0xff] }
 0x2e7   :  { %v325_v59 = vmax.f32 %v312_v51, 0.0  ;;  %v379_v51 = vld [vmem:[%s1437_s8 + $0x10] sm:$0xff] }
 0x2ec   :  { %v314_v37 = vpop.f32.mrf.mxu3 }
 0x2ed   :  { %v315_v49 = vadd.f32 %v793_v45, %v314_v37  ;;  %v395_v37 = vld [vmem:[%s1437_s8 + $0x90] sm:$0xff] }
 0x2ef   :  { %v326_v56 = vmax.f32 %v315_v49, 0.0  ;;  %v380_v49 = vld [vmem:[%s1437_s8 + $0x18] sm:$0xff] }
 0x2f4   :  { %v317_v47 = vpop.f32.mrf.mxu3 }
 0x2f5   :  { %v318_v50 = vadd.f32 %v793_v45, %v317_v47  ;;  %v384_v45 = vld [vmem:[%s1437_s8 + $0x38] sm:$0xff]  ;;  %v383_v47 = vld [vmem:[%s1437_s8 + $0x30] sm:$0xff] }
 0x2f7   :  { %v327_v52 = vmax.f32 %v318_v50, 0.0  ;;  %v377_v50 = vld [vmem:[%s1437_s8] sm:$0xff] }
 0x2f8   :  { %466 = vmatpush.msrb.mxu0 %v377_v50  ;;  %v581_v50 = vld [vmem:[#allocation2 + $0x190] sm:$0xff] }
 0x2f9   :  { %340 = vmatpush.msrb.mxu1 %v327_v52  ;;  %364 = vmatpush.msrb.mxu3 %v327_v52  ;;  %v562_v52 = vld [vmem:[#allocation2 + $0xf8] sm:$0xff] }
 0x2fa   :  { %619 = vmatpush.msra.mxu2 %v562_v52  ;;  %599 = vmatpush.msra.mxu0 %v546_v54  ;;  %v580_v52 = vld [vmem:[#allocation2 + $0x188] sm:$0xff]  ;;  %v579_v54 = vld [vmem:[#allocation2 + $0x180] sm:$0xff] }
 0x2fb   :  { %341 = vmatpush.msrb.mxu1 %v326_v56  ;;  %365 = vmatpush.msrb.mxu3 %v326_v56  ;;  %v545_v56 = vld [vmem:[#allocation2 + $0x70] sm:$0xff] }
 0x2fc   :  { %620 = vmatpush.msra.mxu2 %v561_v53  ;;  %600 = vmatpush.msra.mxu0 %v545_v56  ;;  %v547_v53 = vld [vmem:[#allocation2 + $0x80] sm:$0xff]  ;;  %v693_v56 = vld [vmem:[%s1441_s12 + $0x70] sm:$0xff] }
 0x2fd   :  { %342 = vmatpush.msrb.mxu1 %v325_v59  ;;  %366 = vmatpush.msrb.mxu3 %v325_v59  ;;  %v544_v59 = vld [vmem:[#allocation2 + $0x68] sm:$0xff] }
 0x2fe   :  { %621 = vmatpush.msra.mxu2 %v560_v57  ;;  %601 = vmatpush.msra.mxu0 %v544_v59  ;;  %v692_v57 = vld [vmem:[%s1441_s12 + $0x68] sm:$0xff]  ;;  %v690_v59 = vld [vmem:[%s1441_s12 + $0x58] sm:$0xff] }
 0x2ff   :  { %343 = vmatpush.msrb.mxu1 %v324_v63  ;;  %367 = vmatpush.msrb.mxu3 %v324_v63  ;;  %v543_v63 = vld [vmem:[#allocation2 + $0x60] sm:$0xff] }
 0x300   :  { %622 = vmatpush.msra.mxu2 %v559_v62  ;;  %602 = vmatpush.msra.mxu0 %v543_v63  ;;  %v687_v62 = vld [vmem:[%s1441_s12 + $0x40] sm:$0xff]  ;;  %v686_v63 = vld [vmem:[%s1441_s12 + $0x38] sm:$0xff] }
 0x301   :  { %344 = vmatpush.msrb.mxu1 %v323_v2  ;;  %368 = vmatpush.msrb.mxu3 %v323_v2  ;;  %v558_v2 = vld [vmem:[#allocation2 + $0xd8] sm:$0xff] }
 0x302   :  { %623 = vmatpush.msra.mxu2 %v558_v2  ;;  %603 = vmatpush.msra.mxu0 %v542_v3  ;;  %v684_v2 = vld [vmem:[%s1441_s12 + $0x28] sm:$0xff] }
 0x303   :  { %345 = vmatpush.msrb.mxu1 %v322_v6  ;;  %369 = vmatpush.msrb.mxu3 %v322_v6  ;;  %v575_v6 = vld [vmem:[#allocation2 + $0x160] sm:$0xff] }
 0x304   :  { %624 = vmatpush.msra.mxu2 %v557_v7 }
 0x305   :  { %346 = vmatpush.msrb.mxu1 %v321_v8  ;;  %370 = vmatpush.msrb.mxu3 %v321_v8  ;;  %v541_v8 = vld [vmem:[#allocation2 + $0x50] sm:$0xff] }
 0x306   :  { %604 = vmatpush.msra.mxu0 %v541_v8 }
 0x307   :  { %347 = vmatpush.msrb.mxu1 %v320_v9  ;;  %371 = vmatpush.msrb.mxu3 %v320_v9  ;;  %v589_v9 = vld [vmem:[#allocation2 + $0x1d0] sm:$0xff] }
 0x308   :  { %786 = vmatmul.msk.f32.vlgmr.msrb.gmra.mxu3 %vm144_vm0, %v352_v10  ;;  %785 = vmatmul.msk.f32.vlgmr.msrb.gmra.mxu1 %vm144_vm0, %v328_v11  ;;  %v574_v10 = vld [vmem:[#allocation2 + $0x158] sm:$0xff]  ;;  %v556_v11 = vld [vmem:[#allocation2 + $0xc8] sm:$0xff] }
 0x309   :  { %511 = vmatpush.msra.mxu3 %v440_v12  ;;  %491 = vmatpush.msra.mxu1 %v439_v13  ;;  %v540_v12 = vld [vmem:[#allocation2 + $0x48] sm:$0xff] }
 0x30a   :  { %v588_v13 = vld [vmem:[#allocation2 + $0x1c8] sm:$0xff]  ;;  %625 = vmatpush.msra.mxu2 %v556_v11  ;;  %605 = vmatpush.msra.mxu0 %v540_v12 }
 0x30b   :  { %512 = vmatpush.msra.mxu3 %v436_v14  ;;  %492 = vmatpush.msra.mxu1 %v435_v15  ;;  %v573_v14 = vld [vmem:[#allocation2 + $0x150] sm:$0xff]  ;;  %v555_v15 = vld [vmem:[#allocation2 + $0xc0] sm:$0xff] }
 0x30c   :  { %626 = vmatpush.msra.mxu2 %v555_v15 }
 0x30d   :  { %513 = vmatpush.msra.mxu3 %v432_v16  ;;  %493 = vmatpush.msra.mxu1 %v431_v17  ;;  %v539_v16 = vld [vmem:[#allocation2 + $0x40] sm:$0xff] }
 0x30e   :  { %v587_v17 = vld [vmem:[#allocation2 + $0x1c0] sm:$0xff]  ;;  %606 = vmatpush.msra.mxu0 %v539_v16 }
 0x30f   :  { %514 = vmatpush.msra.mxu3 %v428_v18  ;;  %494 = vmatpush.msra.mxu1 %v427_v19  ;;  %v572_v18 = vld [vmem:[#allocation2 + $0x148] sm:$0xff]  ;;  %v554_v19 = vld [vmem:[#allocation2 + $0xb8] sm:$0xff] }
 0x310   :  { %627 = vmatpush.msra.mxu2 %v554_v19 }
 0x311   :  { %515 = vmatpush.msra.mxu3 %v424_v20  ;;  %495 = vmatpush.msra.mxu1 %v423_v21  ;;  %v538_v20 = vld [vmem:[#allocation2 + $0x38] sm:$0xff] }
 0x312   :  { %v586_v21 = vld [vmem:[#allocation2 + $0x1b8] sm:$0xff]  ;;  %607 = vmatpush.msra.mxu0 %v538_v20 }
 0x313   :  { %516 = vmatpush.msra.mxu3 %v420_v22  ;;  %496 = vmatpush.msra.mxu1 %v419_v23  ;;  %v571_v22 = vld [vmem:[#allocation2 + $0x140] sm:$0xff]  ;;  %v553_v23 = vld [vmem:[#allocation2 + $0xb0] sm:$0xff] }
 0x314   :  { %628 = vmatpush.msra.mxu2 %v553_v23  ;;  %v681_v23 = vld [vmem:[%s1441_s12 + $0x10] sm:$0xff] }
 0x315   :  { %517 = vmatpush.msra.mxu3 %v416_v24  ;;  %497 = vmatpush.msra.mxu1 %v415_v25  ;;  %v537_v24 = vld [vmem:[#allocation2 + $0x30] sm:$0xff] }
 0x316   :  { %v585_v25 = vld [vmem:[#allocation2 + $0x1b0] sm:$0xff]  ;;  %608 = vmatpush.msra.mxu0 %v537_v24  ;;  %v680_v24 = vld [vmem:[%s1441_s12 + $0x8] sm:$0xff] }
 0x317   :  { %518 = vmatpush.msra.mxu3 %v412_v26  ;;  %498 = vmatpush.msra.mxu1 %v411_v27  ;;  %v570_v26 = vld [vmem:[#allocation2 + $0x138] sm:$0xff]  ;;  %v552_v27 = vld [vmem:[#allocation2 + $0xa8] sm:$0xff] }
 0x318   :  { %629 = vmatpush.msra.mxu2 %v552_v27 }
 0x319   :  { %519 = vmatpush.msra.mxu3 %v408_v28  ;;  %499 = vmatpush.msra.mxu1 %v407_v32  ;;  %v536_v28 = vld [vmem:[#allocation2 + $0x28] sm:$0xff]  ;;  %v535_v32 = vld [vmem:[#allocation2 + $0x20] sm:$0xff] }
 0x31a   :  { %609 = vmatpush.msra.mxu0 %v536_v28 }
 0x31b   :  { %520 = vmatpush.msra.mxu3 %v404_v29  ;;  %500 = vmatpush.msra.mxu1 %v403_v33  ;;  %v584_v29 = vld [vmem:[#allocation2 + $0x1a8] sm:$0xff]  ;;  %v583_v33 = vld [vmem:[#allocation2 + $0x1a0] sm:$0xff] }
 0x31c   :  { %610 = vmatpush.msra.mxu0 %v535_v32 }
 0x31d   :  { %521 = vmatpush.msra.mxu3 %v400_v30  ;;  %501 = vmatpush.msra.mxu1 %v399_v35  ;;  %v569_v30 = vld [vmem:[#allocation2 + $0x130] sm:$0xff] }
 0x31e   :  { %v549_v35 = vld [vmem:[#allocation2 + $0x90] sm:$0xff] }
 0x31f   :  { %522 = vmatpush.msra.mxu3 %v396_v31  ;;  %502 = vmatpush.msra.mxu1 %v395_v37  ;;  %v551_v31 = vld [vmem:[#allocation2 + $0xa0] sm:$0xff] }
 0x320   :  { %630 = vmatpush.msra.mxu2 %v551_v31 }
 0x321   :  { %523 = vmatpush.msra.mxu3 %v392_v38  ;;  %503 = vmatpush.msra.mxu1 %v391_v40  ;;  %v567_v40 = vld [vmem:[#allocation2 + $0x120] sm:$0xff] }
 0x322   :  { %631 = vmatpush.msra.mxu2 %v550_v34 }
 0x323   :  { %524 = vmatpush.msra.mxu3 %v388_v41  ;;  %504 = vmatpush.msra.mxu1 %v387_v43  ;;  %v534_v41 = vld [vmem:[#allocation2 + $0x18] sm:$0xff]  ;;  %v533_v43 = vld [vmem:[#allocation2 + $0x10] sm:$0xff] }
 0x324   :  { %632 = vmatpush.msra.mxu2 %v549_v35  ;;  %611 = vmatpush.msra.mxu0 %v534_v41  ;;  %v795_v35 = vld [vmem:[%s1442_s13] ss:$0 sm:$0xff] }
 0x325   :  { %525 = vmatpush.msra.mxu3 %v384_v45  ;;  %505 = vmatpush.msra.mxu1 %v383_v47  ;;  %v532_v45 = vld [vmem:[#allocation2 + $0x8] sm:$0xff]  ;;  %v582_v47 = vld [vmem:[#allocation2 + $0x198] sm:$0xff] }
 0x326   :  { %612 = vmatpush.msra.mxu0 %v533_v43 }
 0x327   :  { %526 = vmatpush.msra.mxu3 %v380_v49  ;;  %506 = vmatpush.msra.mxu1 %v379_v51  ;;  %v563_v49 = vld [vmem:[#allocation2 + $0x100] sm:$0xff]  ;;  %v548_v51 = vld [vmem:[#allocation2 + $0x88] sm:$0xff] }
 0x328   :  { %613 = vmatpush.msra.mxu0 %v532_v45  ;;  %633 = vmatpush.msra.mxu2 %v548_v51 }
 0x329   :  { %659 = vmatpush.msrb.mxu3 %v594_v55  ;;  %639 = vmatpush.msrb.mxu1 %v578_v60  ;;  %v694_v55 = vld [vmem:[%s1441_s12 + $0x78] sm:$0xff]  ;;  %v689_v60 = vld [vmem:[%s1441_s12 + $0x50] sm:$0xff] }
 0x32a   :  { %614 = vmatpush.msra.mxu0 %v531_v48  ;;  %634 = vmatpush.msra.mxu2 %v547_v53 }
 0x32b   :  { %660 = vmatpush.msrb.mxu3 %v593_v58  ;;  %640 = vmatpush.msrb.mxu1 %v577_v0  ;;  %v691_v58 = vld [vmem:[%s1441_s12 + $0x60] sm:$0xff] }
 0x32c   :  { %v441_v0 = vld [vmem:[%s1438_s9] sm:$0xf] }
 0x32d   :  { %661 = vmatpush.msrb.mxu3 %v592_v61  ;;  %641 = vmatpush.msrb.mxu1 %v576_v4  ;;  %v688_v61 = vld [vmem:[%s1441_s12 + $0x48] sm:$0xff]  ;;  %v443_v3 = vperm.slane %v441_v0, 0  ;;  %v445_v4 = vperm.slane %v441_v0, 2 }
 0x32f   :  { %662 = vmatpush.msrb.mxu3 %v591_v1  ;;  %642 = vmatpush.msrb.mxu1 %v575_v6  ;;  %v685_v1 = vld [vmem:[%s1441_s12 + $0x30] sm:$0xff] }
 0x331   :  { %663 = vmatpush.msrb.mxu3 %v590_v5  ;;  %643 = vmatpush.msrb.mxu1 %v574_v10  ;;  %v446_v10 = vperm.slane %v441_v0, 3 }
 0x333   :  { %664 = vmatpush.msrb.mxu3 %v589_v9  ;;  %644 = vmatpush.msrb.mxu1 %v573_v14  ;;  %v444_v9 = vperm.slane %v441_v0, 1 }
 0x335   :  { %665 = vmatpush.msrb.mxu3 %v588_v13  ;;  %645 = vmatpush.msrb.mxu1 %v572_v18 }
 0x337   :  { %666 = vmatpush.msrb.mxu3 %v587_v17  ;;  %646 = vmatpush.msrb.mxu1 %v571_v22  ;;  %v682_v22 = vld [vmem:[%s1441_s12 + $0x18] sm:$0xff] }
 0x339   :  { %667 = vmatpush.msrb.mxu3 %v586_v21  ;;  %647 = vmatpush.msrb.mxu1 %v570_v26  ;;  %v683_v21 = vld [vmem:[%s1441_s12 + $0x20] sm:$0xff] }
 0x33a   :  { %v794_v26 = vld [vmem:[%s1440_s11] ss:$0 sm:$0xff] }
 0x33b   :  { %668 = vmatpush.msrb.mxu3 %v585_v25  ;;  %648 = vmatpush.msrb.mxu1 %v569_v30  ;;  %v679_v25 = vld [vmem:[%s1441_s12] sm:$0xff] }
 0x33d   :  { %669 = vmatpush.msrb.mxu3 %v584_v29  ;;  %649 = vmatpush.msrb.mxu1 %v568_v39 }
 0x33f   :  { %670 = vmatpush.msrb.mxu3 %v583_v33  ;;  %650 = vmatpush.msrb.mxu1 %v567_v40 }
 0x341   :  { %651 = vmatpush.msrb.mxu1 %v566_v42  ;;  %671 = vmatpush.msrb.mxu3 %v582_v47 }
 0x343   :  { %652 = vmatpush.msrb.mxu1 %v565_v44  ;;  %672 = vmatpush.msrb.mxu3 %v581_v50 }
 0x345   :  { %653 = vmatpush.msrb.mxu1 %v564_v46  ;;  %673 = vmatpush.msrb.mxu3 %v580_v52 }
 0x347   :  { %654 = vmatpush.msrb.mxu1 %v563_v49  ;;  %674 = vmatpush.msrb.mxu3 %v579_v54 }
 0x385   :  { %v349_v36 = vpop.f32.mrf.mxu1 }
 0x38b   :  { %v373_v37 = vpop.f32.mrf.mxu3 }
 0x38c   :  { %v376_v38 = vmul.f32 %v373_v37, %v349_v36 }
 0x38e   :  { %487 = vmatmul.f32.vlgmr.msrb.gmra.mxu2 %v376_v38  ;;  %527 = vmatmul.f32.vlgmr.msra.gmra.mxu3 %v376_v38 }
 0x38f   :  { %467 = vmatmul.f32.vlgmr.msrb.gmra.mxu0 %v376_v38  ;;  %507 = vmatmul.f32.vlgmr.msra.gmra.mxu1 %v376_v38 }
 0x390   :  { %699 = vmatpush.msrb.mxu0 %v694_v55 }
 0x392   :  { %700 = vmatpush.msrb.mxu0 %v693_v56 }
 0x394   :  { %701 = vmatpush.msrb.mxu0 %v692_v57 }
 0x396   :  { %702 = vmatpush.msrb.mxu0 %v691_v58 }
 0x398   :  { %703 = vmatpush.msrb.mxu0 %v690_v59 }
 0x39a   :  { %704 = vmatpush.msrb.mxu0 %v689_v60 }
 0x39c   :  { %705 = vmatpush.msrb.mxu0 %v688_v61 }
 0x39e   :  { %706 = vmatpush.msrb.mxu0 %v687_v62 }
 0x3a0   :  { %707 = vmatpush.msrb.mxu0 %v686_v63 }
 0x3a2   :  { %708 = vmatpush.msrb.mxu0 %v685_v1 }
 0x3a4   :  { %709 = vmatpush.msrb.mxu0 %v684_v2 }
 0x3a6   :  { %710 = vmatpush.msrb.mxu0 %v683_v21 }
 0x3a8   :  { %711 = vmatpush.msrb.mxu0 %v682_v22 }
 0x3aa   :  { %712 = vmatpush.msrb.mxu0 %v681_v23 }
 0x3ac   :  { %713 = vmatpush.msrb.mxu0 %v680_v24 }
 0x3ae   :  { %714 = vmatpush.msrb.mxu0 %v679_v25 }
 0x40c   :  { %v468_v5 = vpop.f32.mrf.mxu0  ;;  %v508_v6 = vpop.f32.mrf.mxu1 }
 0x40d   :  { %v469_v7 = vadd.f32 %v468_v5, %v443_v3  ;;  %v509_v8 = vadd.f32 %v508_v6, %v445_v4 }
 0x40f   :  { %615 = vmatmul.f32.vlgmr.msra.gmra.mxu0 %v469_v7  ;;  %655 = vmatmul.f32.vlgmr.msrb.gmra.mxu1 %v509_v8  ;;  %v724_v17 = vrot.slane %v509_v8, 4 }
 0x411   :  { %v488_v11 = vpop.f32.mrf.mxu2  ;;  %v528_v12 = vpop.f32.mrf.mxu3 }
 0x412   :  { %v489_v13 = vadd.f32 %v488_v11, %v444_v9  ;;  %v529_v14 = vadd.f32 %v528_v12, %v446_v10 }
 0x414   :  { %v723_v15 = vrot.slane %v489_v13, 6  ;;  %635 = vmatmul.f32.vlgmr.msra.gmra.mxu2 %v489_v13  ;;  %v725_v16 = vrot.slane %v529_v14, 2  ;;  %675 = vmatmul.f32.vlgmr.msrb.gmra.mxu3 %v529_v14 }
 0x416   :  { %v727_v18 = vsel %vm726_vm1, %v469_v7, %v723_v15  ;;  %v729_v19 = vsel %vm728_vm2, %v724_v17, %v725_v16 }
 0x417   :  { %v731_v20 = vsel %vm730_vm3, %v727_v18, %v729_v19 }
 0x418   :  { %733 = vst [vmem:[#allocation5] sm:$0xff] %v731_v20 }
 0x419   :  { %746 = dma.vmem_to_hbm [thread:$0]  %s742_s25, 128, %s744_s23, [#allocation4]  }
 0x48c   :  { %v616_v27 = vpop.f32.mrf.mxu0  ;;  %v656_v31 = vpop.f32.mrf.mxu1 }
 0x48d   :  { %v617_v28 = vadd.f32 %v794_v26, %v616_v27 }
 0x497   :  { %v636_v29 = vpop.f32.mrf.mxu2  ;;  %v676_v33 = vpop.f32.mrf.mxu3 }
 0x498   :  { %v637_v30 = vadd.f32 %v636_v29, %v617_v28 }
 0x49a   :  { %v657_v32 = vadd.f32 %v656_v31, %v637_v30 }
 0x49c   :  { %v677_v34 = vadd.f32 %v676_v33, %v657_v32 }
 0x49e   :  { %715 = vmatmul.f32.vlgmr.msrb.gmra.mxu0 %v677_v34 }
 0x51b   :  { %v716_v36 = vpop.f32.mrf.mxu0 }
 0x51c   :  { %v717_v37 = vadd.f32 %v795_v35, %v716_v36 }
 0x51e   :  { %735 = vst.msk [vmem:[#allocation6] sm:$0x3] %vm734_vm4, %v717_v37 }
 0x51f   :  { %757 = dma.vmem_to_hbm [thread:$0]  %s753_s26, 32, %s755_s28, [#allocation7]  }
 0x520   :  { %870 = dma.done.wait [#allocation4], 128  }
 0x521   :  { %871 = vsyncadd [#allocation4], 4294967168 }
 0x522   :  { %872 = dma.done.wait [#allocation7], 32  }
 0x523   :  { %873 = vsyncadd [#allocation7], 4294967264 }
 0x524   :  { %766 = vsyncpa [#allocation3], 1 }
 0x525   :  { %767 = vsyncpa [#allocation4], 1 }
 0x526   :  { %768 = vsyncpa [#allocation7], 1 }

</bundles_post_ra>
